<compile_context>
chip_gen: v7x
topology: tpu7x:2x2x1
jax: 0.10.0
libtpu: 0.0.40
codegen_flags: <defaults>
</compile_context>

<pallas_src>
import functools

import jax
import jax.numpy as jnp
from jax import lax
from jax.experimental import pallas as pl
from jax.experimental.pallas import tpu as pltpu

_VMEM = pl.BlockSpec(memory_space=pltpu.MemorySpace.VMEM)
_EPS_SQ = 1e-24  # eps under the sum-of-squares ~ PyTorch F.normalize eps=1e-12


# ----------------------------------------------------------------------------
# Kernel 1: fused (pool-folded) encoder MLP + predictor MLP + L2-norm epilogue
# ----------------------------------------------------------------------------
def _fused_forward_kernel(x_ref, w1_ref, b1_ref, w2_ref, b2_ref,
                          pw1_ref, pb1_ref, pw2_ref, pb2_ref,
                          z_ref, p_ref):
    # x: [TB, C*H*W]; the global average pool is already folded into w1_ref.
    x = x_ref[...]
    h = jnp.dot(x, w1_ref[...], preferred_element_type=jnp.float32) + b1_ref[...]
    h = jnp.maximum(h, 0.0)
    z = jnp.dot(h, w2_ref[...], preferred_element_type=jnp.float32) + b2_ref[...]
    z_ref[...] = z                                   # encoder output (un-normalized)

    # Predictor MLP with fused L2-normalization epilogue (EUP rsqrt).
    hp = jnp.dot(z, pw1_ref[...], preferred_element_type=jnp.float32) + pb1_ref[...]
    hp = jnp.maximum(hp, 0.0)
    p = jnp.dot(hp, pw2_ref[...], preferred_element_type=jnp.float32) + pb2_ref[...]
    inv = lax.rsqrt(jnp.sum(p * p, axis=-1, keepdims=True) + _EPS_SQ)
    p_ref[...] = p * inv


def fused_forward(x, w1_eff, b1, w2, b2, pw1, pb1, pw2, pb2, *, block_rows):
    rows, k_in = x.shape
    d_hid = w1_eff.shape[1]
    d_ssl = w2.shape[1]
    p_hid = pw1.shape[1]

    def wspec(shape):
        return pl.BlockSpec(shape, lambda i: (0, 0))   # weights resident across grid

    row_spec = lambda cols: pl.BlockSpec((block_rows, cols), lambda i: (i, 0))

    z, p = pl.pallas_call(
        _fused_forward_kernel,
        out_shape=(jax.ShapeDtypeStruct((rows, d_ssl), jnp.float32),
                   jax.ShapeDtypeStruct((rows, d_ssl), jnp.float32)),
        grid_spec=pltpu.PrefetchScalarGridSpec(
            num_scalar_prefetch=0,
            grid=(rows // block_rows,),
            in_specs=[row_spec(k_in),
                      wspec((k_in, d_hid)), wspec((1, d_hid)),
                      wspec((d_hid, d_ssl)), wspec((1, d_ssl)),
                      wspec((d_ssl, p_hid)), wspec((1, p_hid)),
                      wspec((p_hid, d_ssl)), wspec((1, d_ssl))],
            out_specs=(row_spec(d_ssl), row_spec(d_ssl)),
        ),
        compiler_params=pltpu.CompilerParams(
            dimension_semantics=("parallel",)),        # megacore sharding on v7x
    )(x, w1_eff, b1, w2, b2, pw1, pb1, pw2, pb2)
    return z, p


# ----------------------------------------------------------------------------
# Kernel 2: fused residual-normalization + 4-term NegCL loss
# ----------------------------------------------------------------------------
def _residual_loss_kernel(z_ref, p_ref, c_ref, o_ref, *, batch):
    z = z_ref[...]          # [2B, D]  (rows 0..B-1 = view 1, B..2B-1 = view 2)
    p = p_ref[...]          # [2B, D]  normalized predictor outputs
    c = c_ref[...]          # [2, D]   row 0: center(centroids_1), row 1: center(centroids_2)

    z1, z2 = z[:batch], z[batch:]
    p1, p2 = p[:batch], p[batch:]
    c1, c2 = c[0:1, :], c[1:2, :]

    def dterm(pred, tgt):
        return 2.0 - 2.0 * jnp.sum(pred * tgt, axis=-1, keepdims=True)

    def norm_rows(x):
        return x * lax.rsqrt(jnp.sum(x * x, axis=-1, keepdims=True) + _EPS_SQ)

    r12 = norm_rows(c2 - z1)          # normalize(center_2 - z_1)
    r21 = norm_rows(c1 - z2)          # normalize(center_1 - z_2)

    # Reference: z_1_pred = p2, z_2_pred = p1, residual_12_pred = p1,
    # residual_21_pred = p2; positive terms use un-normalized z (as in PyTorch).
    loss = dterm(p2, z1) + dterm(p1, z2) + dterm(p1, r12) + dterm(p2, r21)
    o_ref[...] = loss                 # [B, 1]; keep lane-dense at real D/batch


def fused_residual_loss(z_all, p_all, centers, *, batch):
    out = pl.pallas_call(
        functools.partial(_residual_loss_kernel, batch=batch),
        out_shape=jax.ShapeDtypeStruct((batch, 1), jnp.float32),
        in_specs=[_VMEM, _VMEM, _VMEM],
        out_specs=_VMEM,
    )(z_all, p_all, centers)
    return out.reshape(batch)


# ----------------------------------------------------------------------------
# Plain-JAX glue: deterministic Lloyd k-means (faiss replacement)
# ----------------------------------------------------------------------------
def run_kmeans_jax(x, num_clusters):
    results = []
    n = x.shape[0]
    x2 = jnp.sum(x * x, axis=1, keepdims=True)                 # [n, 1]
    for seed, k in enumerate(num_clusters):
        key = jax.random.PRNGKey(seed)
        perm = jax.random.permutation(key, n)
        c = x[perm[:k]]
        for _ in range(3):
            c2 = jnp.sum(c * c, axis=1, keepdims=True).T       # [1, k]
            d = x2 + c2 - 2.0 * (x @ c.T)                      # MXU-form distances
            assign = jnp.argmin(d, axis=1)
            onehot = jax.nn.one_hot(assign, k, dtype=jnp.float32)
            counts = onehot.sum(axis=0)
            sums = onehot.T @ x
            c = jnp.where(counts[:, None] > 0,
                          sums / jnp.maximum(counts[:, None], 1.0), c)
        # F.normalize(centroids, dim=1); tiny [k, D] -> plain jnp (no launch).
        c = c / jnp.maximum(jnp.sqrt(jnp.sum(c * c, axis=1, keepdims=True)), 1e-12)
        results.append(c)
    return results


def mean_of_centroid_means(centroids_list):
    means = jnp.stack([c.mean(axis=0) for c in centroids_list], axis=0)
    return means.mean(axis=0)                                   # [D]


# ----------------------------------------------------------------------------
# Module forward
# ----------------------------------------------------------------------------
def init_mlp_params(key, d_in, d_hid, d_out):
    k1, k2 = jax.random.split(key)
    w1 = jax.random.normal(k1, (d_in, d_hid), jnp.float32) / jnp.sqrt(d_in)
    b1 = jnp.zeros((1, d_hid), jnp.float32)
    w2 = jax.random.normal(k2, (d_hid, d_out), jnp.float32) / jnp.sqrt(d_hid)
    b2 = jnp.zeros((1, d_out), jnp.float32)
    return (w1, b1, w2, b2)


def negcl_forward(enc_params, pred_params, view_1, view_2, num_clusters):
    b, c, h, w = view_1.shape
    hw = h * w
    w1, b1, w2, b2 = enc_params

    # Fold global avg-pool into the first encoder Linear (layout-only, done once).
    w1_eff = (jnp.broadcast_to(w1[:, None, :], (c, hw, w1.shape[1]))
              .reshape(c * hw, w1.shape[1]) / float(hw))

    # Stack both views -> one fused forward launch for encoder+predictor+norm.
    x = jnp.concatenate([view_1, view_2], axis=0).reshape(2 * b, c * hw)
    z_all, p_all = fused_forward(x, w1_eff, b1, w2, b2, *pred_params,
                                 block_rows=b)

    z_1, z_2 = z_all[:b], z_all[b:]

    centroids_1 = run_kmeans_jax(z_1, num_clusters)
    centroids_2 = run_kmeans_jax(z_2, num_clusters)
    centers = jnp.stack([mean_of_centroid_means(centroids_1),
                         mean_of_centroid_means(centroids_2)], axis=0)  # [2, D]

    return fused_residual_loss(z_all, p_all, centers, batch=b)


# ----------------------------------------------------------------------------
# main
# ----------------------------------------------------------------------------
if __name__ == "__main__":
    B, C, H, W = 8, 4, 16, 16          # small synthetic "views"
    SSL_DIM = 32                        # config.model.ssl_feature_dim
    ENC_HIDDEN = 64                     # stand-in encoder hidden width
    PRED_HIDDEN = 128                   # predictor hidden (512/2048 in ref; kept small)
    NUM_CLUSTERS = (2, 4)               # config.train.num_clusters

    key = jax.random.PRNGKey(0)
    k_v1, k_v2, k_enc, k_pred = jax.random.split(key, 4)

    view_1 = jax.random.normal(k_v1, (B, C, H, W), jnp.float32)
    view_2 = jax.random.normal(k_v2, (B, C, H, W), jnp.float32)

    enc_params = init_mlp_params(k_enc, C, ENC_HIDDEN, SSL_DIM)
    pred_params = init_mlp_params(k_pred, SSL_DIM, PRED_HIDDEN, SSL_DIM)

    forward = jax.jit(functools.partial(negcl_forward, num_clusters=NUM_CLUSTERS))
    loss = forward(enc_params, pred_params, view_1, view_2)
    jax.block_until_ready(loss)
    assert loss.shape == (B,)
    print("KERNEL_OK")
</pallas_src>

<mosaic_0001>
module attributes {stable_mosaic.version = 11 : i64} {
  func.func @_fused_forward_kernel(%arg0: i32, %arg1: memref<8x1024xf32, #tpu.memory_space<vmem>>, %arg2: memref<1024x64xf32, #tpu.memory_space<vmem>>, %arg3: memref<1x64xf32, #tpu.memory_space<vmem>>, %arg4: memref<64x32xf32, #tpu.memory_space<vmem>>, %arg5: memref<1x32xf32, #tpu.memory_space<vmem>>, %arg6: memref<32x128xf32, #tpu.memory_space<vmem>>, %arg7: memref<1x128xf32, #tpu.memory_space<vmem>>, %arg8: memref<128x32xf32, #tpu.memory_space<vmem>>, %arg9: memref<1x32xf32, #tpu.memory_space<vmem>>, %arg10: memref<8x32xf32, #tpu.memory_space<vmem>>, %arg11: memref<8x32xf32, #tpu.memory_space<vmem>>) attributes {dimension_semantics = [#tpu.dimension_semantics<parallel>], iteration_bounds = array<i64: 2>, scalar_prefetch = 0 : i64, scratch_operands = 0 : i64, tpu.core_type = #tpu.core_type<tc>, window_params = [{transform_indices = @transform_0, window_bounds = array<i64: 8, 1024>}, {pipeline_mode = #tpu.pipeline_mode<synchronous>, transform_indices = @transform_1, window_bounds = array<i64: 1024, 64>}, {pipeline_mode = #tpu.pipeline_mode<synchronous>, transform_indices = @transform_2, window_bounds = array<i64: 1, 64>}, {pipeline_mode = #tpu.pipeline_mode<synchronous>, transform_indices = @transform_3, window_bounds = array<i64: 64, 32>}, {pipeline_mode = #tpu.pipeline_mode<synchronous>, transform_indices = @transform_4, window_bounds = array<i64: 1, 32>}, {pipeline_mode = #tpu.pipeline_mode<synchronous>, transform_indices = @transform_5, window_bounds = array<i64: 32, 128>}, {pipeline_mode = #tpu.pipeline_mode<synchronous>, transform_indices = @transform_6, window_bounds = array<i64: 1, 128>}, {pipeline_mode = #tpu.pipeline_mode<synchronous>, transform_indices = @transform_7, window_bounds = array<i64: 128, 32>}, {pipeline_mode = #tpu.pipeline_mode<synchronous>, transform_indices = @transform_8, window_bounds = array<i64: 1, 32>}, {transform_indices = @transform_9, window_bounds = array<i64: 8, 32>}, {transform_indices = @transform_10, window_bounds = array<i64: 8, 32>}]} {
    %c0 = arith.constant 0 : index
    %c0_0 = arith.constant 0 : index
    %0 = vector.load %arg1[%c0, %c0_0] : memref<8x1024xf32, #tpu.memory_space<vmem>>, vector<8x1024xf32>
    %c0_1 = arith.constant 0 : index
    %c0_2 = arith.constant 0 : index
    %1 = vector.load %arg2[%c0_1, %c0_2] : memref<1024x64xf32, #tpu.memory_space<vmem>>, vector<1024x64xf32>
    %cst = arith.constant dense<0.000000e+00> : vector<8x64xf32>
    %2 = tpu.matmul %0, %1, %cst {dimension_numbers = #tpu.dot_dimension_numbers<[1], [0], [0], [1], [0, 0, 1, 1], [], []>} : vector<8x1024xf32>, vector<1024x64xf32>, vector<8x64xf32> -> vector<8x64xf32>
    %c0_3 = arith.constant 0 : index
    %c0_4 = arith.constant 0 : index
    %3 = vector.load %arg3[%c0_3, %c0_4] : memref<1x64xf32, #tpu.memory_space<vmem>>, vector<1x64xf32>
    %4 = vector.broadcast %3 : vector<1x64xf32> to vector<8x64xf32>
    %5 = arith.addf %2, %4 : vector<8x64xf32>
    %cst_5 = arith.constant 0.000000e+00 : f32
    %6 = vector.broadcast %cst_5 : f32 to vector<8x64xf32>
    %7 = arith.maximumf %5, %6 : vector<8x64xf32>
    %c0_6 = arith.constant 0 : index
    %c0_7 = arith.constant 0 : index
    %8 = vector.load %arg4[%c0_6, %c0_7] : memref<64x32xf32, #tpu.memory_space<vmem>>, vector<64x32xf32>
    %cst_8 = arith.constant dense<0.000000e+00> : vector<8x32xf32>
    %9 = tpu.matmul %7, %8, %cst_8 {dimension_numbers = #tpu.dot_dimension_numbers<[1], [0], [0], [1], [0, 0, 1, 1], [], []>} : vector<8x64xf32>, vector<64x32xf32>, vector<8x32xf32> -> vector<8x32xf32>
    %c0_9 = arith.constant 0 : index
    %c0_10 = arith.constant 0 : index
    %10 = vector.load %arg5[%c0_9, %c0_10] : memref<1x32xf32, #tpu.memory_space<vmem>>, vector<1x32xf32>
    %11 = vector.broadcast %10 : vector<1x32xf32> to vector<8x32xf32>
    %12 = arith.addf %9, %11 : vector<8x32xf32>
    %c0_11 = arith.constant 0 : index
    %c0_12 = arith.constant 0 : index
    %13 = vector.load %arg10[%c0_11, %c0_12] : memref<8x32xf32, #tpu.memory_space<vmem>>, vector<8x32xf32>
    tpu.vector_store %arg10[%c0_11, %c0_12], %12 {strides = array<i32>} : memref<8x32xf32, #tpu.memory_space<vmem>>, vector<8x32xf32>,
    %c0_13 = arith.constant 0 : index
    %c0_14 = arith.constant 0 : index
    %14 = vector.load %arg6[%c0_13, %c0_14] : memref<32x128xf32, #tpu.memory_space<vmem>>, vector<32x128xf32>
    %cst_15 = arith.constant dense<0.000000e+00> : vector<8x128xf32>
    %15 = tpu.matmul %12, %14, %cst_15 {dimension_numbers = #tpu.dot_dimension_numbers<[1], [0], [0], [1], [0, 0, 1, 1], [], []>} : vector<8x32xf32>, vector<32x128xf32>, vector<8x128xf32> -> vector<8x128xf32>
    %c0_16 = arith.constant 0 : index
    %c0_17 = arith.constant 0 : index
    %16 = vector.load %arg7[%c0_16, %c0_17] : memref<1x128xf32, #tpu.memory_space<vmem>>, vector<1x128xf32>
    %17 = vector.broadcast %16 : vector<1x128xf32> to vector<8x128xf32>
    %18 = arith.addf %15, %17 : vector<8x128xf32>
    %cst_18 = arith.constant 0.000000e+00 : f32
    %19 = vector.broadcast %cst_18 : f32 to vector<8x128xf32>
    %20 = arith.maximumf %18, %19 : vector<8x128xf32>
    %c0_19 = arith.constant 0 : index
    %c0_20 = arith.constant 0 : index
    %21 = vector.load %arg8[%c0_19, %c0_20] : memref<128x32xf32, #tpu.memory_space<vmem>>, vector<128x32xf32>
    %cst_21 = arith.constant dense<0.000000e+00> : vector<8x32xf32>
    %22 = tpu.matmul %20, %21, %cst_21 {dimension_numbers = #tpu.dot_dimension_numbers<[1], [0], [0], [1], [0, 0, 1, 1], [], []>} : vector<8x128xf32>, vector<128x32xf32>, vector<8x32xf32> -> vector<8x32xf32>
    %c0_22 = arith.constant 0 : index
    %c0_23 = arith.constant 0 : index
    %23 = vector.load %arg9[%c0_22, %c0_23] : memref<1x32xf32, #tpu.memory_space<vmem>>, vector<1x32xf32>
    %24 = vector.broadcast %23 : vector<1x32xf32> to vector<8x32xf32>
    %25 = arith.addf %22, %24 : vector<8x32xf32>
    %26 = arith.mulf %25, %25 : vector<8x32xf32>
    %cst_24 = arith.constant dense<0.000000e+00> : vector<8xf32>
    %27 = vector.multi_reduction <add>, %26, %cst_24 [1] : vector<8x32xf32> to vector<8xf32>
    %28 = vector.shape_cast %27 : vector<8xf32> to vector<8x1xf32>
    %cst_25 = arith.constant 1.000000e-24 : f32
    %29 = vector.broadcast %cst_25 : f32 to vector<8x1xf32>
    %30 = arith.addf %28, %29 : vector<8x1xf32>
    %31 = math.rsqrt %30 : vector<8x1xf32>
    %32 = vector.broadcast %31 : vector<8x1xf32> to vector<8x32xf32>
    %33 = arith.mulf %25, %32 : vector<8x32xf32>
    %c0_26 = arith.constant 0 : index
    %c0_27 = arith.constant 0 : index
    %34 = vector.load %arg11[%c0_26, %c0_27] : memref<8x32xf32, #tpu.memory_space<vmem>>, vector<8x32xf32>
    tpu.vector_store %arg11[%c0_26, %c0_27], %33 {strides = array<i32>} : memref<8x32xf32, #tpu.memory_space<vmem>>, vector<8x32xf32>,
    return
  }
  func.func @transform_0(%arg0: i32) -> (i32, i32) {
    %c0_i32 = arith.constant 0 : i32
    %c0_i32_0 = arith.constant 0 : i32
    return %arg0, %c0_i32 : i32, i32
  }
  func.func @transform_1(%arg0: i32) -> (i32, i32) {
    %c0_i32 = arith.constant 0 : i32
    %c0_i32_0 = arith.constant 0 : i32
    %c0_i32_1 = arith.constant 0 : i32
    return %c0_i32, %c0_i32_0 : i32, i32
  }
  func.func @transform_2(%arg0: i32) -> (i32, i32) {
    %c0_i32 = arith.constant 0 : i32
    %c0_i32_0 = arith.constant 0 : i32
    %c0_i32_1 = arith.constant 0 : i32
    return %c0_i32, %c0_i32_0 : i32, i32
  }
  func.func @transform_3(%arg0: i32) -> (i32, i32) {
    %c0_i32 = arith.constant 0 : i32
    %c0_i32_0 = arith.constant 0 : i32
    %c0_i32_1 = arith.constant 0 : i32
    return %c0_i32, %c0_i32_0 : i32, i32
  }
  func.func @transform_4(%arg0: i32) -> (i32, i32) {
    %c0_i32 = arith.constant 0 : i32
    %c0_i32_0 = arith.constant 0 : i32
    %c0_i32_1 = arith.constant 0 : i32
    return %c0_i32, %c0_i32_0 : i32, i32
  }
  func.func @transform_5(%arg0: i32) -> (i32, i32) {
    %c0_i32 = arith.constant 0 : i32
    %c0_i32_0 = arith.constant 0 : i32
    %c0_i32_1 = arith.constant 0 : i32
    return %c0_i32, %c0_i32_0 : i32, i32
  }
  func.func @transform_6(%arg0: i32) -> (i32, i32) {
    %c0_i32 = arith.constant 0 : i32
    %c0_i32_0 = arith.constant 0 : i32
    %c0_i32_1 = arith.constant 0 : i32
    return %c0_i32, %c0_i32_0 : i32, i32
  }
  func.func @transform_7(%arg0: i32) -> (i32, i32) {
    %c0_i32 = arith.constant 0 : i32
    %c0_i32_0 = arith.constant 0 : i32
    %c0_i32_1 = arith.constant 0 : i32
    return %c0_i32, %c0_i32_0 : i32, i32
  }
  func.func @transform_8(%arg0: i32) -> (i32, i32) {
    %c0_i32 = arith.constant 0 : i32
    %c0_i32_0 = arith.constant 0 : i32
    %c0_i32_1 = arith.constant 0 : i32
    return %c0_i32, %c0_i32_0 : i32, i32
  }
  func.func @transform_9(%arg0: i32) -> (i32, i32) {
    %c0_i32 = arith.constant 0 : i32
    %c0_i32_0 = arith.constant 0 : i32
    return %arg0, %c0_i32 : i32, i32
  }
  func.func @transform_10(%arg0: i32) -> (i32, i32) {
    %c0_i32 = arith.constant 0 : i32
    %c0_i32_0 = arith.constant 0 : i32
    return %arg0, %c0_i32 : i32, i32
  }
}

module attributes {stable_mosaic.version = 11 : i64} {
  func.func @_residual_loss_kernel(%arg0: memref<16x32xf32, #tpu.memory_space<vmem>>, %arg1: memref<16x32xf32, #tpu.memory_space<vmem>>, %arg2: memref<2x32xf32, #tpu.memory_space<vmem>>, %arg3: memref<8x1xf32, #tpu.memory_space<vmem>>) attributes {dimension_semantics = [], scalar_prefetch = 0 : i64, scratch_operands = 0 : i64, tpu.core_type = #tpu.core_type<tc>} {
    %c0 = arith.constant 0 : index
    %c0_0 = arith.constant 0 : index
    %0 = vector.load %arg0[%c0, %c0_0] : memref<16x32xf32, #tpu.memory_space<vmem>>, vector<16x32xf32>
    %c0_1 = arith.constant 0 : index
    %c0_2 = arith.constant 0 : index
    %1 = vector.load %arg1[%c0_1, %c0_2] : memref<16x32xf32, #tpu.memory_space<vmem>>, vector<16x32xf32>
    %c0_3 = arith.constant 0 : index
    %c0_4 = arith.constant 0 : index
    %2 = vector.load %arg2[%c0_3, %c0_4] : memref<2x32xf32, #tpu.memory_space<vmem>>, vector<2x32xf32>
    %3 = vector.extract_strided_slice %0 {offsets = [0, 0], sizes = [8, 32], strides = [1, 1]} : vector<16x32xf32> to vector<8x32xf32>
    %4 = vector.extract_strided_slice %0 {offsets = [8, 0], sizes = [8, 32], strides = [1, 1]} : vector<16x32xf32> to vector<8x32xf32>
    %5 = vector.extract_strided_slice %1 {offsets = [0, 0], sizes = [8, 32], strides = [1, 1]} : vector<16x32xf32> to vector<8x32xf32>
    %6 = vector.extract_strided_slice %1 {offsets = [8, 0], sizes = [8, 32], strides = [1, 1]} : vector<16x32xf32> to vector<8x32xf32>
    %7 = vector.extract_strided_slice %2 {offsets = [0, 0], sizes = [1, 32], strides = [1, 1]} : vector<2x32xf32> to vector<1x32xf32>
    %8 = vector.extract_strided_slice %2 {offsets = [1, 0], sizes = [1, 32], strides = [1, 1]} : vector<2x32xf32> to vector<1x32xf32>
    %9 = vector.broadcast %8 : vector<1x32xf32> to vector<8x32xf32>
    %10 = arith.subf %9, %3 : vector<8x32xf32>
    %11 = arith.mulf %10, %10 : vector<8x32xf32>
    %cst = arith.constant dense<0.000000e+00> : vector<8xf32>
    %12 = vector.multi_reduction <add>, %11, %cst [1] : vector<8x32xf32> to vector<8xf32>
    %13 = vector.shape_cast %12 : vector<8xf32> to vector<8x1xf32>
    %cst_5 = arith.constant 1.000000e-24 : f32
    %14 = vector.broadcast %cst_5 : f32 to vector<8x1xf32>
    %15 = arith.addf %13, %14 : vector<8x1xf32>
    %16 = math.rsqrt %15 : vector<8x1xf32>
    %17 = vector.broadcast %16 : vector<8x1xf32> to vector<8x32xf32>
    %18 = arith.mulf %10, %17 : vector<8x32xf32>
    %19 = vector.broadcast %7 : vector<1x32xf32> to vector<8x32xf32>
    %20 = arith.subf %19, %4 : vector<8x32xf32>
    %21 = arith.mulf %20, %20 : vector<8x32xf32>
    %cst_6 = arith.constant dense<0.000000e+00> : vector<8xf32>
    %22 = vector.multi_reduction <add>, %21, %cst_6 [1] : vector<8x32xf32> to vector<8xf32>
    %23 = vector.shape_cast %22 : vector<8xf32> to vector<8x1xf32>
    %cst_7 = arith.constant 1.000000e-24 : f32
    %24 = vector.broadcast %cst_7 : f32 to vector<8x1xf32>
    %25 = arith.addf %23, %24 : vector<8x1xf32>
    %26 = math.rsqrt %25 : vector<8x1xf32>
    %27 = vector.broadcast %26 : vector<8x1xf32> to vector<8x32xf32>
    %28 = arith.mulf %20, %27 : vector<8x32xf32>
    %29 = arith.mulf %6, %3 : vector<8x32xf32>
    %cst_8 = arith.constant dense<0.000000e+00> : vector<8xf32>
    %30 = vector.multi_reduction <add>, %29, %cst_8 [1] : vector<8x32xf32> to vector<8xf32>
    %31 = vector.shape_cast %30 : vector<8xf32> to vector<8x1xf32>
    %cst_9 = arith.constant 2.000000e+00 : f32
    %32 = vector.broadcast %cst_9 : f32 to vector<8x1xf32>
    %33 = arith.mulf %32, %31 : vector<8x1xf32>
    %cst_10 = arith.constant 2.000000e+00 : f32
    %34 = vector.broadcast %cst_10 : f32 to vector<8x1xf32>
    %35 = arith.subf %34, %33 : vector<8x1xf32>
    %36 = arith.mulf %5, %4 : vector<8x32xf32>
    %cst_11 = arith.constant dense<0.000000e+00> : vector<8xf32>
    %37 = vector.multi_reduction <add>, %36, %cst_11 [1] : vector<8x32xf32> to vector<8xf32>
    %38 = vector.shape_cast %37 : vector<8xf32> to vector<8x1xf32>
    %cst_12 = arith.constant 2.000000e+00 : f32
    %39 = vector.broadcast %cst_12 : f32 to vector<8x1xf32>
    %40 = arith.mulf %39, %38 : vector<8x1xf32>
    %cst_13 = arith.constant 2.000000e+00 : f32
    %41 = vector.broadcast %cst_13 : f32 to vector<8x1xf32>
    %42 = arith.subf %41, %40 : vector<8x1xf32>
    %43 = arith.addf %35, %42 : vector<8x1xf32>
    %44 = arith.mulf %5, %18 : vector<8x32xf32>
    %cst_14 = arith.constant dense<0.000000e+00> : vector<8xf32>
    %45 = vector.multi_reduction <add>, %44, %cst_14 [1] : vector<8x32xf32> to vector<8xf32>
    %46 = vector.shape_cast %45 : vector<8xf32> to vector<8x1xf32>
    %cst_15 = arith.constant 2.000000e+00 : f32
    %47 = vector.broadcast %cst_15 : f32 to vector<8x1xf32>
    %48 = arith.mulf %47, %46 : vector<8x1xf32>
    %cst_16 = arith.constant 2.000000e+00 : f32
    %49 = vector.broadcast %cst_16 : f32 to vector<8x1xf32>
    %50 = arith.subf %49, %48 : vector<8x1xf32>
    %51 = arith.addf %43, %50 : vector<8x1xf32>
    %52 = arith.mulf %6, %28 : vector<8x32xf32>
    %cst_17 = arith.constant dense<0.000000e+00> : vector<8xf32>
    %53 = vector.multi_reduction <add>, %52, %cst_17 [1] : vector<8x32xf32> to vector<8xf32>
    %54 = vector.shape_cast %53 : vector<8xf32> to vector<8x1xf32>
    %cst_18 = arith.constant 2.000000e+00 : f32
    %55 = vector.broadcast %cst_18 : f32 to vector<8x1xf32>
    %56 = arith.mulf %55, %54 : vector<8x1xf32>
    %cst_19 = arith.constant 2.000000e+00 : f32
    %57 = vector.broadcast %cst_19 : f32 to vector<8x1xf32>
    %58 = arith.subf %57, %56 : vector<8x1xf32>
    %59 = arith.addf %51, %58 : vector<8x1xf32>
    %c0_20 = arith.constant 0 : index
    %c0_21 = arith.constant 0 : index
    %60 = vector.load %arg3[%c0_20, %c0_21] : memref<8x1xf32, #tpu.memory_space<vmem>>, vector<8x1xf32>
    tpu.vector_store %arg3[%c0_20, %c0_21], %59 {strides = array<i32>} : memref<8x1xf32, #tpu.memory_space<vmem>>, vector<8x1xf32>,
    return
  }
}

</mosaic_0001>

<bundles_post_ra>
// kernel: negcl_forward.2
= control target key start
LH: loop header
LB: loop body
LE: loop exit
PB: predicated region body
PF: predicated region fallthrough
CT: control target
= control target key end

     0   :  { %s1657_s13 = smov 0   ;;  %s2206_s0 = inlined_call_operand.vmem [shape: f32[16,1024], index: 0, kind: input, shape index: {}]   ;;  %s2207_s1 = inlined_call_operand.vmem [shape: f32[1024,64], index: 1, kind: input, shape index: {}]   ;;  %s2208_s2 = inlined_call_operand.vmem [shape: f32[1,64], index: 2, kind: input, shape index: {}]   ;;  %s2209_s3 = inlined_call_operand.vmem [shape: f32[64,32], index: 3, kind: input, shape index: {}]   ;;  %s2210_s4 = inlined_call_operand.vmem [shape: f32[1,32], index: 4, kind: input, shape index: {}]   ;;  %s2211_s5 = inlined_call_operand.vmem [shape: f32[32,128], index: 5, kind: input, shape index: {}]   ;;  %s2212_s6 = inlined_call_operand.vmem [shape: f32[1,128], index: 6, kind: input, shape index: {}]   ;;  %s2213_s7 = inlined_call_operand.vmem [shape: f32[128,32], index: 7, kind: input, shape index: {}]   ;;  %s2214_s8 = inlined_call_operand.vmem [shape: f32[1,32], index: 8, kind: input, shape index: {}]   ;;  %s2215_s9 = inlined_call_operand.vmem [shape: f32[16,32], index: 9, kind: output, shape index: {0}]   ;;  %s2216_s10 = inlined_call_operand.vmem [shape: f32[16,32], index: 10, kind: output, shape index: {1}]  }
   0x1 LB: > { %s1154_s14 = sadd.s32 4294967295, %s1597_s13   ;;  %p1158_p0 = scmp.ge.s32.totalorder %s1597_s13, 1  ;;  %s1597_s13 = sphi %s1657_s13, %s21_s13  }
   0x2   : > { %p315_p1 = scmp.lt.s32.totalorder %s1597_s13, 3 }
   0x4   : > { %p316_p2 = pnand %p1158_p0, %p315_p1 }
   0x5   : > { %v393_v0 = vld [vmem:[%s2207_s1 + $0x80] sm:$0xff] (!%p316_p2)  ;;  %v394_v1 = vld [vmem:[%s2207_s1 + $0x88] sm:$0xff] (!%p316_p2)  ;;  %v395_v11 = vld [vmem:[%s2207_s1 + $0x90] sm:$0xff] (!%p316_p2)  ;;  %p1739_p3 = scmp.lt.s32.totalorder (!%p316_p2), %s1154_s14, 1  ;;  %vm1600_vm0 = vmmov (!%p316_p2), 0   ;;  %vm808_vm1 = vcmask (!%p316_p2), 523264  }
   0x6   : > { %319 = sbr.rel (%p316_p2) target bundleno = 1098 (0x44a), region = 56  ;;  %v377_v2 = vld [vmem:[%s2207_s1] sm:$0xff] (!%p316_p2)  ;;  %v1408_v3 = vpack.c.bf16 (!%p316_p2), %v394_v1, %v393_v0  ;;  %v378_v4 = vld [vmem:[%s2207_s1 + $0x8] sm:$0xff] (!%p316_p2)  ;;  %v396_v13 = vld [vmem:[%s2207_s1 + $0x98] sm:$0xff] (!%p316_p2)  ;;  %vm882_vm2 = vcmask (!%p316_p2), 261120  }
   0x7   : > { %v425_v5 = vld [vmem:[%s2207_s1 + $0x180] sm:$0xff] (!%p316_p2)  ;;  %v426_v6 = vld [vmem:[%s2207_s1 + $0x188] sm:$0xff] (!%p316_p2)  ;;  %v1410_v7 = vpack.c.bf16 (!%p316_p2), %v378_v4, %v377_v2  ;;  %v379_v14 = vld [vmem:[%s2207_s1 + $0x10] sm:$0xff] (!%p316_p2)  ;;  %v1412_v16 = vpack.c.bf16 (!%p316_p2), %v396_v13, %v395_v11 }
   0x8   : > { %v1440_v8 = vpack.c.bf16 (!%p316_p2), %v426_v6, %v425_v5  ;;  %v409_v9 = vld [vmem:[%s2207_s1 + $0x100] sm:$0xff] (!%p316_p2)  ;;  %v410_v10 = vld [vmem:[%s2207_s1 + $0x108] sm:$0xff] (!%p316_p2)  ;;  %1409 = vmatprep.subr.bf16.mxu0 (!%p316_p2), %v1408_v3  ;;  %v380_v15 = vld [vmem:[%s2207_s1 + $0x18] sm:$0xff] (!%p316_p2) }
   0x9   : > { %v1442_v12 = vpack.c.bf16 (!%p316_p2), %v410_v10, %v409_v9  ;;  %1411 = vmatpush3.bf16.msra.mxu0 (!%p316_p2), %v1410_v7  ;;  %v1414_v17 = vpack.c.bf16 (!%p316_p2), %v380_v15, %v379_v14  ;;  %v427_v18 = vld [vmem:[%s2207_s1 + $0x190] sm:$0xff] (!%p316_p2)  ;;  %v428_v19 = vld [vmem:[%s2207_s1 + $0x198] sm:$0xff] (!%p316_p2)  ;;  %v397_v23 = vld [vmem:[%s2207_s1 + $0xa0] sm:$0xff] (!%p316_p2) }
   0xa   : > { %1441 = vmatprep.subr.bf16.mxu1 (!%p316_p2), %v1440_v8  ;;  %v411_v20 = vld [vmem:[%s2207_s1 + $0x110] sm:$0xff] (!%p316_p2)  ;;  %v1444_v21 = vpack.c.bf16 (!%p316_p2), %v428_v19, %v427_v18  ;;  %v412_v22 = vld [vmem:[%s2207_s1 + $0x118] sm:$0xff] (!%p316_p2)  ;;  %v398_v24 = vld [vmem:[%s2207_s1 + $0xa8] sm:$0xff] (!%p316_p2)  ;;  %1413 = vmatprep.subr.bf16.mxu0 (!%p316_p2), %v1412_v16 }
   0xb   : > { %1443 = vmatpush3.bf16.msra.mxu1 (!%p316_p2), %v1442_v12  ;;  %v1446_v25 = vpack.c.bf16 (!%p316_p2), %v412_v22, %v411_v20  ;;  %v1416_v26 = vpack.c.bf16 (!%p316_p2), %v398_v24, %v397_v23  ;;  %v381_v27 = vld [vmem:[%s2207_s1 + $0x20] sm:$0xff] (!%p316_p2)  ;;  %v382_v28 = vld [vmem:[%s2207_s1 + $0x28] sm:$0xff] (!%p316_p2)  ;;  %v399_v35 = vld [vmem:[%s2207_s1 + $0xb0] sm:$0xff] (!%p316_p2) }
   0xc   : > { %v429_v29 = vld [vmem:[%s2207_s1 + $0x1a0] sm:$0xff] (!%p316_p2)  ;;  %1445 = vmatprep.subr.bf16.mxu1 (!%p316_p2), %v1444_v21  ;;  %v430_v30 = vld [vmem:[%s2207_s1 + $0x1a8] sm:$0xff] (!%p316_p2)  ;;  %v1418_v33 = vpack.c.bf16 (!%p316_p2), %v382_v28, %v381_v27  ;;  %v400_v36 = vld [vmem:[%s2207_s1 + $0xb8] sm:$0xff] (!%p316_p2) }
   0xd   : > { %v413_v31 = vld [vmem:[%s2207_s1 + $0x120] sm:$0xff]  ;;  %v414_v32 = vld [vmem:[%s2207_s1 + $0x128] sm:$0xff]  ;;  %1415 = vmatpush3.bf16.msra.mxu0 %v1414_v17  ;;  %v1448_v34 = vpack.c.bf16 %v430_v30, %v429_v29  ;;  %v383_v37 = vld [vmem:[%s2207_s1 + $0x30] sm:$0xff]  ;;  %v1420_v39 = vpack.c.bf16 %v400_v36, %v399_v35  ;;  %s2219_s14 = smov (!%p1739_p3, %s1154_s14), 1 }
   0xe   : > { %1417 = vmatprep.subr.bf16.mxu0 %v1416_v26  ;;  %v1450_v38 = vpack.c.bf16 %v414_v32, %v413_v31  ;;  %v384_v40 = vld [vmem:[%s2207_s1 + $0x38] sm:$0xff]  ;;  %v431_v41 = vld [vmem:[%s2207_s1 + $0x1b0] sm:$0xff]  ;;  %v401_v46 = vld [vmem:[%s2207_s1 + $0xc0] sm:$0xff]  ;;  %s1171_s15 = sshll.u32 %s2219_s14, 6  ;;  %s1161_s17 = sshll.u32 %s2219_s14, 3 }
   0xf   : > { %1447 = vmatpush3.bf16.msra.mxu1 %v1446_v25  ;;  %v432_v42 = vld [vmem:[%s2207_s1 + $0x1b8] sm:$0xff]  ;;  %v415_v44 = vld [vmem:[%s2207_s1 + $0x130] sm:$0xff]  ;;  %v402_v47 = vld [vmem:[%s2207_s1 + $0xc8] sm:$0xff]  ;;  %v1422_v48 = vpack.c.bf16 %v384_v40, %v383_v37  ;;  %s1831_s30 = scalar_lea.vmem %s2206_s0, %s1171_s15  ;;  %s364_s15 = scalar_lea.vmem %s2215_s9, %s1161_s17 }
  0x10   : > { %1449 = vmatprep.subr.bf16.mxu1 %v1448_v34  ;;  %v1452_v43 = vpack.c.bf16 %v432_v42, %v431_v41  ;;  %v416_v45 = vld [vmem:[%s2207_s1 + $0x138] sm:$0xff]  ;;  %v433_v49 = vld [vmem:[%s2207_s1 + $0x1c0] sm:$0xff]  ;;  %v434_v50 = vld [vmem:[%s2207_s1 + $0x1c8] sm:$0xff]  ;;  %v1424_v52 = vpack.c.bf16 %v402_v47, %v401_v46  ;;  %s368_s12 = scalar_lea.vmem %s2216_s10, %s1161_s17 }
  0x11   : > { %1419 = vmatpush3.bf16.msra.mxu0 %v1418_v33  ;;  %v1454_v51 = vpack.c.bf16 %v416_v45, %v415_v44  ;;  %v385_v53 = vld [vmem:[%s2207_s1 + $0x40] sm:$0xff]  ;;  %v386_v54 = vld [vmem:[%s2207_s1 + $0x48] sm:$0xff]  ;;  %v1456_v56 = vpack.c.bf16 %v434_v50, %v433_v49  ;;  %v403_v58 = vld [vmem:[%s2207_s1 + $0xd0] sm:$0xff] }
  0x12   : > { %1421 = vmatprep.subr.bf16.mxu0 %v1420_v39  ;;  %v417_v55 = vld [vmem:[%s2207_s1 + $0x140] sm:$0xff]  ;;  %v418_v57 = vld [vmem:[%s2207_s1 + $0x148] sm:$0xff]  ;;  %v404_v59 = vld [vmem:[%s2207_s1 + $0xd8] sm:$0xff]  ;;  %v1426_v62 = vpack.c.bf16 %v386_v54, %v385_v53 }
  0x13   : > { %1451 = vmatpush3.bf16.msra.mxu1 %v1450_v38  ;;  %v435_v60 = vld [vmem:[%s2207_s1 + $0x1d0] sm:$0xff]  ;;  %v436_v61 = vld [vmem:[%s2207_s1 + $0x1d8] sm:$0xff]  ;;  %v1458_v63 = vpack.c.bf16 %v418_v57, %v417_v55  ;;  %v1428_v0 = vpack.c.bf16 %v404_v59, %v403_v58  ;;  %v405_v6 = vld [vmem:[%s2207_s1 + $0xe0] sm:$0xff] }
  0x14   : > { %1453 = vmatprep.subr.bf16.mxu1 %v1452_v43  ;;  %v387_v1 = vld [vmem:[%s2207_s1 + $0x50] sm:$0xff]  ;;  %v388_v2 = vld [vmem:[%s2207_s1 + $0x58] sm:$0xff]  ;;  %v1460_v4 = vpack.c.bf16 %v436_v61, %v435_v60  ;;  %v406_v7 = vld [vmem:[%s2207_s1 + $0xe8] sm:$0xff] }
  0x15   : > { %1423 = vmatpush3.bf16.msra.mxu0 %v1422_v48  ;;  %v419_v3 = vld [vmem:[%s2207_s1 + $0x150] sm:$0xff]  ;;  %v420_v5 = vld [vmem:[%s2207_s1 + $0x158] sm:$0xff]  ;;  %v437_v8 = vld [vmem:[%s2207_s1 + $0x1e0] sm:$0xff]  ;;  %v1430_v10 = vpack.c.bf16 %v388_v2, %v387_v1  ;;  %v1432_v14 = vpack.c.bf16 %v406_v7, %v405_v6 }
  0x16   : > { %1425 = vmatprep.subr.bf16.mxu0 %v1424_v52  ;;  %v438_v9 = vld [vmem:[%s2207_s1 + $0x1e8] sm:$0xff]  ;;  %v389_v11 = vld [vmem:[%s2207_s1 + $0x60] sm:$0xff]  ;;  %v1462_v13 = vpack.c.bf16 %v420_v5, %v419_v3  ;;  %v407_v19 = vld [vmem:[%s2207_s1 + $0xf0] sm:$0xff] }
  0x17   : > { %1455 = vmatpush3.bf16.msra.mxu1 %v1454_v51  ;;  %v390_v12 = vld [vmem:[%s2207_s1 + $0x68] sm:$0xff]  ;;  %v421_v15 = vld [vmem:[%s2207_s1 + $0x160] sm:$0xff]  ;;  %v1464_v18 = vpack.c.bf16 %v438_v9, %v437_v8  ;;  %v408_v20 = vld [vmem:[%s2207_s1 + $0xf8] sm:$0xff] }
  0x18   : > { %1457 = vmatprep.subr.bf16.mxu1 %v1456_v56  ;;  %v422_v16 = vld [vmem:[%s2207_s1 + $0x168] sm:$0xff]  ;;  %v372_v21 = vld [vmem:[%s1831_s30 + $0x18] sm:$0xff]  ;;  %v439_v22 = vld [vmem:[%s2207_s1 + $0x1f0] sm:$0xff]  ;;  %v1434_v24 = vpack.c.bf16 %v390_v12, %v389_v11  ;;  %v1436_v26 = vpack.c.bf16 %v408_v20, %v407_v19 }
  0x19   : > { %1427 = vmatpush3.bf16.msra.mxu0 %v1426_v62  ;;  %v370_v17 = vld [vmem:[%s1831_s30 + $0x8] sm:$0xff]  ;;  %v440_v23 = vld [vmem:[%s2207_s1 + $0x1f8] sm:$0xff]  ;;  %646 = vmatprep.mubr.f32.mxu1 %v372_v21  ;;  %v1466_v25 = vpack.c.bf16 %v422_v16, %v421_v15  ;;  %v391_v27 = vld [vmem:[%s2207_s1 + $0x70] sm:$0xff] }
  0x1a   : > { %1429 = vmatprep.subr.bf16.mxu0 %v1428_v0  ;;  %576 = vmatprep.mubr.f32.mxu0 %v370_v17  ;;  %v392_v28 = vld [vmem:[%s2207_s1 + $0x78] sm:$0xff]  ;;  %v423_v29 = vld [vmem:[%s2207_s1 + $0x170] sm:$0xff]  ;;  %v1468_v30 = vpack.c.bf16 %v440_v23, %v439_v22  ;;  %v457_v32 = vld [vmem:[%s2207_s1 + $0x280] sm:$0xff] }
  0x1b   : > { %1459 = vmatpush3.bf16.msra.mxu1 %v1458_v63  ;;  %v424_v31 = vld [vmem:[%s2207_s1 + $0x178] sm:$0xff]  ;;  %v458_v33 = vld [vmem:[%s2207_s1 + $0x288] sm:$0xff]  ;;  %v489_v34 = vld [vmem:[%s2207_s1 + $0x380] sm:$0xff]  ;;  %v1438_v36 = vpack.c.bf16 %v392_v28, %v391_v27 }
  0x1c   : > { %1461 = vmatprep.subr.bf16.mxu1 %v1460_v4  ;;  %v490_v35 = vld [vmem:[%s2207_s1 + $0x388] sm:$0xff]  ;;  %v1470_v37 = vpack.c.bf16 %v424_v31, %v423_v29  ;;  %v1472_v38 = vpack.c.bf16 %v458_v33, %v457_v32  ;;  %v441_v39 = vld [vmem:[%s2207_s1 + $0x200] sm:$0xff]  ;;  %v459_v44 = vld [vmem:[%s2207_s1 + $0x290] sm:$0xff] }
  0x1d   : > { %1431 = vmatpush3.bf16.msra.mxu0 %v1430_v10  ;;  %v442_v40 = vld [vmem:[%s2207_s1 + $0x208] sm:$0xff]  ;;  %v473_v41 = vld [vmem:[%s2207_s1 + $0x300] sm:$0xff]  ;;  %v1504_v42 = vpack.c.bf16 %v490_v35, %v489_v34  ;;  %v460_v45 = vld [vmem:[%s2207_s1 + $0x298] sm:$0xff] }
  0x1e   : > { %1433 = vmatprep.subr.bf16.mxu0 %v1432_v14  ;;  %v474_v43 = vld [vmem:[%s2207_s1 + $0x308] sm:$0xff]  ;;  %v491_v46 = vld [vmem:[%s2207_s1 + $0x390] sm:$0xff]  ;;  %v492_v47 = vld [vmem:[%s2207_s1 + $0x398] sm:$0xff]  ;;  %v1474_v49 = vpack.c.bf16 %v442_v40, %v441_v39  ;;  %v1476_v52 = vpack.c.bf16 %v460_v45, %v459_v44 }
  0x1f   : > { %1463 = vmatpush3.bf16.msra.mxu1 %v1462_v13  ;;  %v369_v48 = vld [vmem:[%s1831_s30] sm:$0xff]  ;;  %v371_v50 = vld [vmem:[%s1831_s30 + $0x10] sm:$0xff]  ;;  %v1506_v51 = vpack.c.bf16 %v474_v43, %v473_v41  ;;  %v444_v54 = vld [vmem:[%s2207_s1 + $0x218] sm:$0xff]  ;;  %v1508_v56 = vpack.c.bf16 %v492_v47, %v491_v46 }
  0x20   : > { %1465 = vmatprep.subr.bf16.mxu1 %v1464_v18  ;;  %v443_v53 = vld [vmem:[%s2207_s1 + $0x210] sm:$0xff]  ;;  %v476_v57 = vld [vmem:[%s2207_s1 + $0x318] sm:$0xff]  ;;  %v461_v58 = vld [vmem:[%s2207_s1 + $0x2a0] sm:$0xff] }
  0x21   : > { %1435 = vmatpush3.bf16.msra.mxu0 %v1434_v24  ;;  %v475_v55 = vld [vmem:[%s2207_s1 + $0x310] sm:$0xff]  ;;  %v462_v59 = vld [vmem:[%s2207_s1 + $0x2a8] sm:$0xff]  ;;  %v493_v60 = vld [vmem:[%s2207_s1 + $0x3a0] sm:$0xff]  ;;  %v1478_v62 = vpack.c.bf16 %v444_v54, %v443_v53 }
  0x22   : > { %1437 = vmatprep.subr.bf16.mxu0 %v1436_v26  ;;  %v494_v61 = vld [vmem:[%s2207_s1 + $0x3a8] sm:$0xff]  ;;  %v1510_v63 = vpack.c.bf16 %v476_v57, %v475_v55  ;;  %v1480_v0 = vpack.c.bf16 %v462_v59, %v461_v58  ;;  %v445_v1 = vld [vmem:[%s2207_s1 + $0x220] sm:$0xff]  ;;  %v463_v6 = vld [vmem:[%s2207_s1 + $0x2b0] sm:$0xff] }
  0x23   : > { %1467 = vmatpush3.bf16.msra.mxu1 %v1466_v25  ;;  %v446_v2 = vld [vmem:[%s2207_s1 + $0x228] sm:$0xff]  ;;  %v477_v3 = vld [vmem:[%s2207_s1 + $0x320] sm:$0xff]  ;;  %v1512_v4 = vpack.c.bf16 %v494_v61, %v493_v60  ;;  %v464_v7 = vld [vmem:[%s2207_s1 + $0x2b8] sm:$0xff] }
  0x24   : > { %1469 = vmatprep.subr.bf16.mxu1 %v1468_v30  ;;  %v478_v5 = vld [vmem:[%s2207_s1 + $0x328] sm:$0xff]  ;;  %v495_v8 = vld [vmem:[%s2207_s1 + $0x3b0] sm:$0xff]  ;;  %v496_v9 = vld [vmem:[%s2207_s1 + $0x3b8] sm:$0xff]  ;;  %v1482_v10 = vpack.c.bf16 %v446_v2, %v445_v1  ;;  %v1484_v12 = vpack.c.bf16 %v464_v7, %v463_v6 }
  0x25   : > { %1439 = vmatpush3.bf16.msra.mxu0 %v1438_v36  ;;  %v1514_v11 = vpack.c.bf16 %v478_v5, %v477_v3  ;;  %v447_v13 = vld [vmem:[%s2207_s1 + $0x230] sm:$0xff]  ;;  %v448_v14 = vld [vmem:[%s2207_s1 + $0x238] sm:$0xff]  ;;  %v1516_v16 = vpack.c.bf16 %v496_v9, %v495_v8  ;;  %v465_v18 = vld [vmem:[%s2207_s1 + $0x2c0] sm:$0xff] }
  0x26   : > { %1473 = vmatprep.subr.bf16.mxu0 %v1472_v38  ;;  %v479_v15 = vld [vmem:[%s2207_s1 + $0x330] sm:$0xff]  ;;  %v480_v17 = vld [vmem:[%s2207_s1 + $0x338] sm:$0xff]  ;;  %v466_v19 = vld [vmem:[%s2207_s1 + $0x2c8] sm:$0xff]  ;;  %v1486_v22 = vpack.c.bf16 %v448_v14, %v447_v13 }
  0x27   : > { %1471 = vmatpush3.bf16.msra.mxu1 %v1470_v37  ;;  %v497_v20 = vld [vmem:[%s2207_s1 + $0x3c0] sm:$0xff]  ;;  %v498_v21 = vld [vmem:[%s2207_s1 + $0x3c8] sm:$0xff]  ;;  %v376_v24 = vld [vmem:[%s1831_s30 + $0x38] sm:$0xff]  ;;  %v1518_v25 = vpack.c.bf16 %v480_v17, %v479_v15  ;;  %v1488_v26 = vpack.c.bf16 %v466_v19, %v465_v18 }
  0x28   : > { %1505 = vmatprep.subr.bf16.mxu1 %v1504_v42  ;;  %577 = vmatmul.mubr.f32.vlgmr.msra.gmra.mrb[0].mxu0 %v369_v48  ;;  %v374_v23 = vld [vmem:[%s1831_s30 + $0x28] sm:$0xff]  ;;  %v449_v27 = vld [vmem:[%s2207_s1 + $0x240] sm:$0xff]  ;;  %v1520_v30 = vpack.c.bf16 %v498_v21, %v497_v20  ;;  %v467_v32 = vld [vmem:[%s2207_s1 + $0x2d0] sm:$0xff]  ;;  %v1601_v21 = vmov 0.0  }
  0x29   : > { %1475 = vmatpush3.bf16.msra.mxu0 %v1474_v49  ;;  %v450_v28 = vld [vmem:[%s2207_s1 + $0x248] sm:$0xff]  ;;  %v481_v29 = vld [vmem:[%s2207_s1 + $0x340] sm:$0xff]  ;;  %v468_v33 = vld [vmem:[%s2207_s1 + $0x2d8] sm:$0xff]  ;;  %716 = vmatprep.mubr.f32.mxu0 %v374_v23 }
  0x2a   : > { %647 = vmatmul.mubr.f32.vlgmr.msra.gmra.mrb[0].mxu1 %v371_v50  ;;  %1477 = vmatprep.subr.bf16.mxu0 %v1476_v52  ;;  %v482_v31 = vld [vmem:[%s2207_s1 + $0x348] sm:$0xff]  ;;  %v499_v34 = vld [vmem:[%s2207_s1 + $0x3d0] sm:$0xff]  ;;  %v500_v35 = vld [vmem:[%s2207_s1 + $0x3d8] sm:$0xff]  ;;  %v1490_v36 = vpack.c.bf16 %v450_v28, %v449_v27  ;;  %v1492_v38 = vpack.c.bf16 %v468_v33, %v467_v32 }
  0x2b   : > { %1507 = vmatpush3.bf16.msra.mxu1 %v1506_v51  ;;  %786 = vmatprep.mubr.f32.mxu1 %v376_v24  ;;  %v1522_v37 = vpack.c.bf16 %v482_v31, %v481_v29  ;;  %v451_v39 = vld [vmem:[%s2207_s1 + $0x250] sm:$0xff]  ;;  %v452_v40 = vld [vmem:[%s2207_s1 + $0x258] sm:$0xff]  ;;  %v1524_v42 = vpack.c.bf16 %v500_v35, %v499_v34  ;;  %v469_v44 = vld [vmem:[%s2207_s1 + $0x2e0] sm:$0xff] }
  0x2c   : > { %1509 = vmatprep.subr.bf16.mxu1 %v1508_v56  ;;  %v483_v41 = vld [vmem:[%s2207_s1 + $0x350] sm:$0xff]  ;;  %v484_v43 = vld [vmem:[%s2207_s1 + $0x358] sm:$0xff]  ;;  %v470_v45 = vld [vmem:[%s2207_s1 + $0x2e8] sm:$0xff]  ;;  %v1494_v48 = vpack.c.bf16 %v452_v40, %v451_v39 }
  0x2d   : > { %1479 = vmatpush3.bf16.msra.mxu0 %v1478_v62  ;;  %v501_v46 = vld [vmem:[%s2207_s1 + $0x3e0] sm:$0xff]  ;;  %v502_v47 = vld [vmem:[%s2207_s1 + $0x3e8] sm:$0xff]  ;;  %v1526_v49 = vpack.c.bf16 %v484_v43, %v483_v41  ;;  %v1496_v50 = vpack.c.bf16 %v470_v45, %v469_v44  ;;  %v471_v56 = vld [vmem:[%s2207_s1 + $0x2f0] sm:$0xff] }
  0x2e   : > { %1481 = vmatprep.subr.bf16.mxu0 %v1480_v0  ;;  %v453_v51 = vld [vmem:[%s2207_s1 + $0x260] sm:$0xff]  ;;  %v454_v52 = vld [vmem:[%s2207_s1 + $0x268] sm:$0xff]  ;;  %v1528_v54 = vpack.c.bf16 %v502_v47, %v501_v46  ;;  %v472_v57 = vld [vmem:[%s2207_s1 + $0x2f8] sm:$0xff] }
  0x2f   : > { %1511 = vmatpush3.bf16.msra.mxu1 %v1510_v63  ;;  %v485_v53 = vld [vmem:[%s2207_s1 + $0x360] sm:$0xff]  ;;  %v486_v55 = vld [vmem:[%s2207_s1 + $0x368] sm:$0xff]  ;;  %v503_v58 = vld [vmem:[%s2207_s1 + $0x3f0] sm:$0xff]  ;;  %v1498_v60 = vpack.c.bf16 %v454_v52, %v453_v51  ;;  %v1500_v62 = vpack.c.bf16 %v472_v57, %v471_v56 }
  0x30   : > { %1513 = vmatprep.subr.bf16.mxu1 %v1512_v4  ;;  %v504_v59 = vld [vmem:[%s2207_s1 + $0x3f8] sm:$0xff]  ;;  %v1530_v61 = vpack.c.bf16 %v486_v55, %v485_v53  ;;  %v455_v63 = vld [vmem:[%s2207_s1 + $0x270] sm:$0xff]  ;;  %v373_v6 = vld [vmem:[%s1831_s30 + $0x20] sm:$0xff] }
  0x31   : > { %1483 = vmatpush3.bf16.msra.mxu0 %v1482_v10  ;;  %v456_v0 = vld [vmem:[%s2207_s1 + $0x278] sm:$0xff]  ;;  %v1532_v1 = vpack.c.bf16 %v504_v59, %v503_v58  ;;  %v487_v2 = vld [vmem:[%s2207_s1 + $0x370] sm:$0xff]  ;;  %v793_v8 = vld [vmem:[%s2209_s3] sm:$0xff] }
  0x32   : > { %1485 = vmatprep.subr.bf16.mxu0 %v1484_v12  ;;  %v488_v3 = vld [vmem:[%s2207_s1 + $0x378] sm:$0xff]  ;;  %v1502_v4 = vpack.c.bf16 %v456_v0, %v455_v63  ;;  %v375_v7 = vld [vmem:[%s1831_s30 + $0x30] sm:$0xff]  ;;  %v794_v9 = vld [vmem:[%s2209_s3 + $0x8] sm:$0xff] }
  0x33   : > { %1515 = vmatpush3.bf16.msra.mxu1 %v1514_v11  ;;  %v1534_v5 = vpack.c.bf16 %v488_v3, %v487_v2  ;;  %v795_v10 = vld [vmem:[%s2209_s3 + $0x10] sm:$0xff]  ;;  %v1599_v11 = vmov 0.0|0.0   ;;  %v1537_v12 = vpack.c.bf16 %v794_v9, %v793_v8  ;;  %v796_v13 = vld [vmem:[%s2209_s3 + $0x18] sm:$0xff]  ;;  %v797_v15 = vld [vmem:[%s2209_s3 + $0x20] sm:$0xff] }
  0x34   : > { %1517 = vmatprep.subr.bf16.mxu1 %v1516_v16  ;;  %v1540_v14 = vpack.c.bf16 %v796_v13, %v795_v10  ;;  %v798_v16 = vld [vmem:[%s2209_s3 + $0x28] sm:$0xff]  ;;  %v799_v18 = vld [vmem:[%s2209_s3 + $0x30] sm:$0xff]  ;;  %v800_v19 = vld [vmem:[%s2209_s3 + $0x38] sm:$0xff] }
  0x35   : > { %1487 = vmatpush3.bf16.msra.mxu0 %v1486_v22  ;;  %v1543_v17 = vpack.c.bf16 %v798_v16, %v797_v15  ;;  %v1546_v20 = vpack.c.bf16 %v800_v19, %v799_v18  ;;  %v1163_v23 = vld [vmem:[%s2208_s2] ss:$0 sm:$0xff]  ;;  %v885_v39 = vld [vmem:[%s2211_s5 + $0x8] sm:$0xff]  ;;  %v886_v43 = vld [vmem:[%s2211_s5 + $0x10] sm:$0xff] }
  0x36   : > { %1489 = vmatprep.subr.bf16.mxu0 %v1488_v26  ;;  %v887_v44 = vld [vmem:[%s2211_s5 + $0x18] sm:$0xff]  ;;  %v969_v46 = vld [vmem:[%s2213_s7] sm:$0xff]  ;;  %v970_v47 = vld [vmem:[%s2213_s7 + $0x8] sm:$0xff] }
  0x37   : > { %1519 = vmatpush3.bf16.msra.mxu1 %v1518_v25  ;;  %v1552_v45 = vpack.c.bf16 %v887_v44, %v886_v43  ;;  %v973_v52 = vld [vmem:[%s2213_s7 + $0x20] sm:$0xff]  ;;  %v974_v53 = vld [vmem:[%s2213_s7 + $0x28] sm:$0xff]  ;;  %v975_v55 = vld [vmem:[%s2213_s7 + $0x30] sm:$0xff] }
  0x38   : > { %1521 = vmatprep.subr.bf16.mxu1 %v1520_v30  ;;  %v976_v56 = vld [vmem:[%s2213_s7 + $0x38] sm:$0xff]  ;;  %v977_v58 = vld [vmem:[%s2213_s7 + $0x40] sm:$0xff]  ;;  %v978_v59 = vld [vmem:[%s2213_s7 + $0x48] sm:$0xff] }
  0x39   : > { %1491 = vmatpush3.bf16.msra.mxu0 %v1490_v36  ;;  %v1564_v57 = vpack.c.bf16 %v976_v56, %v975_v55  ;;  %v981_v0 = vld [vmem:[%s2213_s7 + $0x60] sm:$0xff]  ;;  %v984_v8 = vld [vmem:[%s2213_s7 + $0x78] sm:$0xff] }
  0x3a   : > { %1493 = vmatprep.subr.bf16.mxu0 %v1492_v38  ;;  %v884_v38 = vld [vmem:[%s2211_s5] sm:$0xff] }
  0x3b   : > { %1523 = vmatpush3.bf16.msra.mxu1 %v1522_v37  ;;  %v1549_v41 = vpack.c.bf16 %v885_v39, %v884_v38  ;;  %v1164_v3 = vld [vmem:[%s2210_s4] ss:$0 sm:$0xff] }
  0x3c   : > { %1525 = vmatprep.subr.bf16.mxu1 %v1524_v42  ;;  %v1166_v10 = vld [vmem:[%s2212_s6] ss:$0 sm:$0xff] }
  0x3d   : > { %1495 = vmatpush3.bf16.msra.mxu0 %v1494_v48  ;;  %v971_v48 = vld [vmem:[%s2213_s7 + $0x10] sm:$0xff]  ;;  %v1168_v15 = vld [vmem:[%s2214_s8] ss:$0 sm:$0xff] }
  0x3e   : > { %1497 = vmatprep.subr.bf16.mxu0 %v1496_v50  ;;  %v972_v50 = vld [vmem:[%s2213_s7 + $0x18] sm:$0xff] }
  0x3f   : > { %1527 = vmatpush3.bf16.msra.mxu1 %v1526_v49  ;;  %v1555_v49 = vpack.c.bf16 %v970_v47, %v969_v46  ;;  %v1558_v51 = vpack.c.bf16 %v972_v50, %v971_v48 }
  0x40   : > { %1529 = vmatprep.subr.bf16.mxu1 %v1528_v54  ;;  %v1561_v54 = vpack.c.bf16 %v974_v53, %v973_v52 }
  0x41   : > { %1499 = vmatpush3.bf16.msra.mxu0 %v1498_v60  ;;  %v1567_v60 = vpack.c.bf16 %v978_v59, %v977_v58 }
  0x42   : > { %1501 = vmatprep.subr.bf16.mxu0 %v1500_v62  ;;  %v980_v62 = vld [vmem:[%s2213_s7 + $0x58] sm:$0xff] }
  0x43   : > { %1531 = vmatpush3.bf16.msra.mxu1 %v1530_v61  ;;  %v979_v61 = vld [vmem:[%s2213_s7 + $0x50] sm:$0xff] }
  0x44   : > { %1533 = vmatprep.subr.bf16.mxu1 %v1532_v1  ;;  %v1570_v63 = vpack.c.bf16 %v980_v62, %v979_v61  ;;  %v982_v1 = vld [vmem:[%s2213_s7 + $0x68] sm:$0xff] }
  0x45   : > { %1503 = vmatpush3.bf16.msra.mxu0 %v1502_v4  ;;  %v1573_v2 = vpack.c.bf16 %v982_v1, %v981_v0 }
  0x46   : > { %1536 = vmatprep.subr.bf16.mxu0 %v1599_v11 }
  0x47   : > { %1535 = vmatpush3.bf16.msra.mxu1 %v1534_v5 }
  0x48   : > { %717 = vmatmul.mubr.f32.vlgmr.msra.gmra.mrb[2].mxu0 %v373_v6  ;;  %1554 = vmatprep.subr.bf16.mxu1 %v1599_v11 }
  0x49   : > { %1538 = vmatpush3.bf16.msra.mxu0 %v1537_v12  ;;  %1359 = vmatprep.mubr.msk.f32.mxu0 %vm1600_vm0, %v1601_v21 }
  0x4a   : > { %787 = vmatmul.mubr.f32.vlgmr.msra.gmra.mrb[2].mxu1 %v375_v7  ;;  %1539 = vmatprep.subr.bf16.mxu0 %v1599_v11  ;;  %v983_v7 = vld [vmem:[%s2213_s7 + $0x70] sm:$0xff] }
  0x4b   : > { %1405 = vmatprep.mubr.msk.f32.mxu1 %vm1600_vm0, %v1601_v21  ;;  %1556 = vmatpush3.bf16.msra.mxu1 %v1555_v49  ;;  %v1576_v9 = vpack.c.bf16 %v984_v8, %v983_v7 }
  0x4c   : > { %1557 = vmatprep.subr.bf16.mxu1 %v1599_v11 }
  0x4d   : > { %1541 = vmatpush3.bf16.msra.mxu0 %v1540_v14 }
  0x4e   : > { %1542 = vmatprep.subr.bf16.mxu0 %v1599_v11 }
  0x4f   : > { %1559 = vmatpush3.bf16.msra.mxu1 %v1558_v51 }
  0x50   : > { %1560 = vmatprep.subr.bf16.mxu1 %v1599_v11 }
  0x51   : > { %1544 = vmatpush3.bf16.msra.mxu0 %v1543_v17 }
  0x52   : > { %1545 = vmatprep.subr.bf16.mxu0 %v1599_v11 }
  0x53   : > { %1562 = vmatpush3.bf16.msra.mxu1 %v1561_v54 }
  0x54   : > { %1563 = vmatprep.subr.bf16.mxu1 %v1599_v11 }
  0x55   : > { %1547 = vmatpush3.bf16.msra.mxu0 %v1546_v20 }
  0x56   : > { %1548 = vmatprep.subr.bf16.mxu0 %v1599_v11 }
  0x57   : > { %1565 = vmatpush3.bf16.msra.mxu1 %v1564_v57 }
  0x58   : > { %1566 = vmatprep.subr.bf16.mxu1 %v1599_v11 }
  0x5b   : > { %1568 = vmatpush3.bf16.msra.mxu1 %v1567_v60 }
  0x5c   : > { %1569 = vmatprep.subr.bf16.mxu1 %v1599_v11 }
  0x5f   : > { %1571 = vmatpush3.bf16.msra.mxu1 %v1570_v63 }
  0x60   : > { %1572 = vmatprep.subr.bf16.mxu1 %v1599_v11 }
  0x63   : > { %1574 = vmatpush3.bf16.msra.mxu1 %v1573_v2 }
  0x64   : > { %1575 = vmatprep.subr.bf16.mxu1 %v1599_v11 }
  0x67   : > { %1577 = vmatpush3.bf16.msra.mxu1 %v1576_v9 }
  0xfb   : > { %v1204_v22 = vpop.f32.mrb[0].mxu0 }
  0xfc   : > { %v1205_v24 = vpop.f32.mrb[1].mxu0 }
  0xfd   : > { %v1239_v25 = vpop.f32.mrb[0].mxu1  ;;  %v1206_v26 = vadd.f32 %v1205_v24, %v1204_v22 }
  0xfe   : > { %v1240_v27 = vpop.f32.mrb[1].mxu1 }
  0xff   : > { %v1241_v28 = vadd.f32 %v1240_v27, %v1239_v25  ;;  %v579_v29 = vadd.f32 %v1206_v26, %v1163_v23 }
 0x101   : > { %v649_v30 = vadd.f32 %v1241_v28, %v579_v29 }
 0x11b   : > { %v1274_v31 = vpop.f32.mrb[2].mxu0 }
 0x11c   : > { %v1275_v32 = vpop.f32.mrb[3].mxu0 }
 0x11d   : > { %v1309_v33 = vpop.f32.mrb[2].mxu1  ;;  %v1276_v34 = vadd.f32 %v1275_v32, %v1274_v31 }
 0x11e   : > { %v1310_v35 = vpop.f32.mrb[3].mxu1 }
 0x11f   : > { %v1311_v36 = vadd.f32 %v1310_v35, %v1309_v33  ;;  %v719_v37 = vadd.f32 %v1276_v34, %v649_v30 }
 0x121   : > { %v789_v40 = vadd.f32 %v1311_v36, %v719_v37 }
 0x123   : > { %v792_v42 = vmax.f32 %v789_v40, 0.0 }
 0x125   : > { %1360 = vmatmul.mubr.msk.f32.vlgmr.msra.gmra.mrb[4].mxu0 %vm808_vm1, %v792_v42 }
 0x126   : > { %1550 = vmatpush3.bf16.msra.mxu0 %v1549_v41  ;;  %1370 = vmatprep.mubr.msk.f32.mxu0 %vm1600_vm0, %v1601_v21 }
 0x127   : > { %1551 = vmatprep.subr.bf16.mxu0 %v1599_v11 }
 0x12a   : > { %1553 = vmatpush3.bf16.msra.mxu0 %v1552_v45 }
 0x1f8   : > { %v878_v4 = vpop.f32.mrb[4].mxu0 }
 0x1f9   : > { %v879_v5 = vadd.f32 %v1164_v3, %v878_v4  ;;  %v1361_v6 = vpop.f32.mrb[5].mxu0 }
 0x1fb   : > { %883 = vst.msk [vmem:[%s364_s15] sm:$0xff] %vm882_vm2, %v879_v5  ;;  %1371 = vmatmul.mubr.msk.f32.vlgmr.msra.gmra.mrb[6].mxu0 %vm882_vm2, %v879_v5 }
 0x2ce   : > { %v964_v11 = vpop.f32.mrb[6].mxu0 }
 0x2cf   : > { %v965_v12 = vadd.f32 %v1166_v10, %v964_v11  ;;  %v1372_v13 = vpop.f32.mrb[7].mxu0 }
 0x2d1   : > { %v968_v14 = vmax.f32 %v965_v12, 0.0 }
 0x2d3   : > { %1406 = vmatmul.mubr.f32.vlgmr.msra.gmra.mrb[4].mxu1 %v968_v14 }
 0x3a6   : > { %v1058_v16 = vpop.f32.mrb[4].mxu1 }
 0x3a7   : > { %v1059_v17 = vadd.f32 %v1168_v15, %v1058_v16  ;;  %v1407_v18 = vpop.f32.mrb[5].mxu1 }
 0x3a9   : > { %v1062_v19 = vmul.f32 %v1059_v17, %v1059_v17 }
 0x3ab   : > { %v1063_v20 = vsel %vm882_vm2, %v1062_v19, 0.0 }
 0x3ac   : > { %1064 = vadd.xlane.f32.xlu0 %v1063_v20 }
 0x439   : > { %v1065_v21 = vpop.xlane.xlu0 %1064 }
 0x43a   : > { %v1066_v22 = vadd.f32 1e-24, %v1065_v21 }
 0x43c   : > { %1589 = vrsqrt.f32 %v1066_v22 }
 0x446   : > { %v1590_v23 = vpop.eup %1589 }
 0x447   : > { %v1068_v24 = vmul.f32 %v1590_v23, %v1059_v17 }
 0x449   : > { %1069 = vst.msk [vmem:[%s368_s12] sm:$0xff] %vm882_vm2, %v1068_v24 }
 0x44a PF: > { %s21_s13 = sadd.s32 1, %s1597_s13  }
 0x44b   : > { %p18_p4 = scmp.ge.s32.totalorder %s21_s13, 4  }
 0x44d   :  { %20 = sbr.rel (!%p18_p4) target bundleno = 1 (0x1), region = 98 }

// kernel: negcl_forward.3
= control target key start
LH: loop header
LB: loop body
LE: loop exit
PB: predicated region body
PF: predicated region fallthrough
CT: control target
= control target key end

     0   :  { %v19_v0 = vlaneseq  ;;  %vm25_vm0 = vcmask 261120   ;;  %vm71_vm1 = vcmask 7168   ;;  %s125_s2 = inlined_call_operand.vmem [shape: f32[2,32], index: 2, kind: input, shape index: {}]   ;;  %s126_s0 = inlined_call_operand.vmem [shape: f32[16,32], index: 0, kind: input, shape index: {}]   ;;  %s127_s1 = inlined_call_operand.vmem [shape: f32[16,32], index: 1, kind: input, shape index: {}]   ;;  %s128_s3 = inlined_call_operand.vmem [shape: f32[8,1], index: 3, kind: output, shape index: {}]  }
   0x1   :  { %v18_v2 = vld [vmem:[%s125_s2] sm:$0x3]  ;;  %v15_v6 = vld [vmem:[%s126_s0 + $0x8] sm:$0xff] }
   0x2   :  { %v20_v1 = vshrl.u32 %v19_v0, 7  ;;  %v14_v5 = vld [vmem:[%s126_s0] sm:$0xff]  ;;  %v17_v15 = vld [vmem:[%s127_s1 + $0x8] sm:$0xff] }
   0x3   :  { %v16_v16 = vld [vmem:[%s127_s1] sm:$0xff]  ;;  %v44_v17 = vmul.f32 %v17_v15, %v14_v5 }
   0x4   :  { %v21_v3 = vsub.s32 1, %v20_v1  ;;  %v34_v4 = vsub.s32 0, %v20_v1  ;;  %v50_v18 = vmul.f32 %v16_v16, %v15_v6 }
   0x5   :  { %v45_v19 = vsel %vm25_vm0, %v44_v17, 0.0 }
   0x6   :  { %v22_v7 = vrot.slane %v18_v2, %v21_v3  ;;  %v35_v8 = vrot.slane %v18_v2, %v34_v4  ;;  %46 = vadd.xlane.f32.xlu1 %v45_v19  ;;  %v51_v20 = vsel %vm25_vm0, %v50_v18, 0.0 }
   0x8   :  { %v23_v9 = vsub.f32 %v22_v7, %v14_v5  ;;  %v36_v10 = vsub.f32 %v35_v8, %v15_v6 }
   0xa   :  { %v24_v11 = vmul.f32 %v23_v9, %v23_v9  ;;  %v37_v12 = vmul.f32 %v36_v10, %v36_v10  ;;  %52 = vadd.xlane.f32.xlu1 %v51_v20 }
   0xc   :  { %v26_v13 = vsel %vm25_vm0, %v24_v11, 0.0  ;;  %v38_v14 = vsel %vm25_vm0, %v37_v12, 0.0 }
   0xd   :  { %27 = vadd.xlane.f32.xlu0 %v26_v13 }
  0x11   :  { %39 = vadd.xlane.f32.xlu0 %v38_v14 }
  0x93   :  { %v47_v33 = vpop.xlane.xlu1 %46 }
  0x94   :  { %v48_v35 = vmul.f32 2.0, %v47_v33 }
  0x96   :  { %v49_v38 = vsub.f32 2.0, %v48_v35 }
  0x97   :  { %v53_v34 = vpop.xlane.xlu1 %52 }
  0x98   :  { %v54_v36 = vmul.f32 2.0, %v53_v34 }
  0x9a   :  { %v28_v21 = vpop.xlane.xlu0 %27  ;;  %v55_v39 = vsub.f32 2.0, %v54_v36 }
  0x9b   :  { %v29_v22 = vadd.f32 1e-24, %v28_v21 }
  0x9c   :  { %v56_v43 = vadd.f32 %v55_v39, %v49_v38 }
  0x9d   :  { %77 = vrsqrt.f32 %v29_v22 }
  0x9e   :  { %v40_v23 = vpop.xlane.xlu0 %39 }
  0x9f   :  { %v41_v24 = vadd.f32 1e-24, %v40_v23 }
  0xa1   :  { %79 = vrsqrt.f32 %v41_v24 }
  0xa7   :  { %v78_v25 = vpop.eup %77 }
  0xa8   :  { %v31_v26 = vmul.f32 %v78_v25, %v23_v9 }
  0xaa   :  { %v57_v27 = vmul.f32 %v31_v26, %v16_v16 }
  0xab   :  { %v80_v28 = vpop.eup %79 }
  0xac   :  { %v58_v29 = vsel %vm25_vm0, %v57_v27, 0.0  ;;  %v43_v30 = vmul.f32 %v80_v28, %v36_v10 }
  0xad   :  { %59 = vadd.xlane.f32.xlu0 %v58_v29 }
  0xae   :  { %v64_v31 = vmul.f32 %v43_v30, %v17_v15 }
  0xb0   :  { %v65_v32 = vsel %vm25_vm0, %v64_v31, 0.0 }
  0xb1   :  { %66 = vadd.xlane.f32.xlu1 %v65_v32 }
 0x13a   :  { %v60_v37 = vpop.xlane.xlu0 %59 }
 0x13b   :  { %v61_v40 = vmul.f32 2.0, %v60_v37 }
 0x13d   :  { %v62_v41 = vsub.f32 2.0, %v61_v40 }
 0x13e   :  { %v67_v42 = vpop.xlane.xlu1 %66 }
 0x13f   :  { %v68_v44 = vmul.f32 2.0, %v67_v42  ;;  %v63_v45 = vadd.f32 %v62_v41, %v56_v43 }
 0x141   :  { %v69_v46 = vsub.f32 2.0, %v68_v44 }
 0x143   :  { %v70_v47 = vadd.f32 %v69_v46, %v63_v45 }
 0x145   :  { %72 = vst.msk [vmem:[%s128_s3] sm:$0xff] %vm71_vm1, %v70_v47 }

</bundles_post_ra>
